<compile_context>
chip_gen: v6e
topology: v6e:2x2x1
jax: 0.10.0
libtpu: 0.0.40
codegen_flags: <defaults>
</compile_context>

<pallas_src>
import jax
import jax.numpy as jnp
from jax.experimental import pallas as pl
from jax.experimental.pallas import tpu as pltpu

IN_DIM = 16
HID = 12
AUG = IN_DIM + 1          # 17 rows per weight block (inputs + fused-bias row)
BLOCK_W = 6 * HID         # 72 columns per block (widest stage: fused m|d heads)

_SELU_ALPHA = 1.6732632423543772848170429916717
_SELU_SCALE = 1.0507009873554804934193349852946


def _selu(x):
    return _SELU_SCALE * jnp.where(x > 0, x, _SELU_ALPHA * (jnp.exp(x) - 1.0))


def dynamics_net_kernel(x_ref, w_ref, out_ref):
    """x_ref: (B, 16), w_ref: (3, 17, 72) packed slab, out_ref: (B, 24)."""
    B = x_ref.shape[0]
    one = jnp.ones((B, 1), jnp.float32)
    # Constant tail [1, 0, 0, 0, 0]: selects the fused-bias row (row 12) of the
    # 12->12 weight blocks; the trailing zero rows of the slab make the padding
    # harmless. Constant-folds at trace time.
    tail = jnp.concatenate([one, jnp.zeros((B, AUG - HID - 1), jnp.float32)], axis=1)

    def cell(inp_aug, stage, width):
        # One MXU pass per cell computes all live gates [i | g | o] (+ bias).
        gates = jnp.dot(inp_aug, w_ref[stage], preferred_element_type=jnp.float32)
        i = jax.nn.sigmoid(gates[:, 0:width])
        g = jnp.tanh(gates[:, width:2 * width])
        o = jax.nn.sigmoid(gates[:, 2 * width:3 * width])
        return o * jnp.tanh(i * g)          # new hidden state (c0 == 0 => c = i*g)

    xa = jnp.concatenate([x_ref[...], one], axis=1)          # (B, 17) = [x, 1]
    h1 = jnp.maximum(cell(xa, 0, HID), 0.0)                  # ReLU
    h1a = jnp.concatenate([h1, tail], axis=1)                # (B, 17)
    h2 = _selu(cell(h1a, 1, HID))                            # SELU
    h2a = jnp.concatenate([h2, tail], axis=1)                # (B, 17)
    md = jnp.tanh(cell(h2a, 2, 2 * HID))                     # (B, 24) = [m | d]
    out_ref[...] = md.astype(out_ref.dtype)                  # single contiguous store


def dynamics_net_forward(x, w_slab):
    """x: (B, 16) f32, w_slab: (3, 17, 72) f32 packed parameters -> (2B, 12)."""
    B = x.shape[0]
    vmem = pl.BlockSpec(memory_space=pltpu.MemorySpace.VMEM)
    md = pl.pallas_call(
        dynamics_net_kernel,
        out_shape=jax.ShapeDtypeStruct((B, 2 * HID), jnp.float32),
        in_specs=[vmem, vmem],
        out_specs=vmem,
    )(x, w_slab)
    # torch.cat([m, d], dim=0)
    return jnp.concatenate([md[:, :HID], md[:, HID:]], axis=0)


# ----------------------------- parameters ---------------------------------

def _xavier_uniform(key, shape):
    fan_out, fan_in = shape  # PyTorch LSTMCell weights are (4H, in_dim)
    limit = jnp.sqrt(6.0 / (fan_in + fan_out))
    return jax.random.uniform(key, shape, jnp.float32, -limit, limit)


def init_raw_params(key):
    """PyTorch-shaped parameters per cell: weight_ih (4H, in), fused bias (4H,)."""
    ks = jax.random.split(key, 16)
    raw = {}
    specs = [("1", IN_DIM), ("2", HID), ("m", HID), ("d", HID)]
    bias_bound = 1.0 / jnp.sqrt(HID)
    for idx, (name, in_dim) in enumerate(specs):
        k_wih, k_whh, k_bih, k_bhh = ks[4 * idx: 4 * idx + 4]
        w_ih = _xavier_uniform(k_wih, (4 * HID, in_dim))
        _w_hh = _xavier_uniform(k_whh, (4 * HID, HID))  # present in module; no effect (h0 = 0)
        b_ih = jax.random.uniform(k_bih, (4 * HID,), jnp.float32, -bias_bound, bias_bound)
        b_hh = jax.random.uniform(k_bhh, (4 * HID,), jnp.float32, -bias_bound, bias_bound)
        raw["w_" + name] = w_ih
        raw["b_" + name] = b_ih + b_hh
    return raw


def _igo_rows(w):   # (4H, in) -> (3H, in); PyTorch gate order [i, f, g, o], f dropped
    return jnp.concatenate([w[0:HID], w[2 * HID:3 * HID], w[3 * HID:4 * HID]], axis=0)


def _igo_vec(b):
    return jnp.concatenate([b[0:HID], b[2 * HID:3 * HID], b[3 * HID:4 * HID]], axis=0)


def pack_params(raw):
    """Pack all four cells into one (3, 17, 72) slab, biases as an extra row."""
    slab = jnp.zeros((3, AUG, BLOCK_W), jnp.float32)

    # stage 0: l1 (16 -> 12), gate columns [i | g | o], bias in row 16
    slab = slab.at[0, 0:IN_DIM, 0:3 * HID].set(_igo_rows(raw["w_1"]).T)
    slab = slab.at[0, IN_DIM, 0:3 * HID].set(_igo_vec(raw["b_1"]))

    # stage 1: l2 (12 -> 12), bias in row 12 (rows 13..16 stay zero)
    slab = slab.at[1, 0:HID, 0:3 * HID].set(_igo_rows(raw["w_2"]).T)
    slab = slab.at[1, HID, 0:3 * HID].set(_igo_vec(raw["b_2"]))

    # stage 2: fused l3_mean | l3_dev, columns [i_m|i_d | g_m|g_d | o_m|o_d]
    wm, wd = raw["w_m"], raw["w_d"]
    bm, bd = raw["b_m"], raw["b_d"]
    w3 = jnp.concatenate(
        [wm[0:HID].T, wd[0:HID].T,
         wm[2 * HID:3 * HID].T, wd[2 * HID:3 * HID].T,
         wm[3 * HID:4 * HID].T, wd[3 * HID:4 * HID].T], axis=1)   # (12, 72)
    b3 = jnp.concatenate(
        [bm[0:HID], bd[0:HID],
         bm[2 * HID:3 * HID], bd[2 * HID:3 * HID],
         bm[3 * HID:4 * HID], bd[3 * HID:4 * HID]], axis=0)       # (72,)
    slab = slab.at[2, 0:HID, :].set(w3)
    slab = slab.at[2, HID, :].set(b3)
    return slab


# ----------------------------- reference ----------------------------------

def _reference_forward(x, raw):
    """Pure-JAX reference of the same math (full PyTorch gate layout)."""
    def cell(xx, w_ih, b):
        g = xx @ w_ih.T + b
        i = jax.nn.sigmoid(g[:, 0:HID])
        gg = jnp.tanh(g[:, 2 * HID:3 * HID])
        o = jax.nn.sigmoid(g[:, 3 * HID:4 * HID])
        return o * jnp.tanh(i * gg)          # c0 = 0 => c = i * g

    h1 = jax.nn.relu(cell(x, raw["w_1"], raw["b_1"]))
    h2 = jax.nn.selu(cell(h1, raw["w_2"], raw["b_2"]))
    m = jnp.tanh(cell(h2, raw["w_m"], raw["b_m"]))
    d = jnp.tanh(cell(h2, raw["w_d"], raw["b_d"]))
    return jnp.concatenate([m, d], axis=0)


if __name__ == "__main__":
    key = jax.random.PRNGKey(0)
    k_param, k_x = jax.random.split(key)
    raw = init_raw_params(k_param)
    w_slab = pack_params(raw)

    B = 4
    x = jax.random.normal(k_x, (B, IN_DIM), jnp.float32)

    out = jax.block_until_ready(dynamics_net_forward(x, w_slab))
    ref = _reference_forward(x, raw)

    assert out.shape == (2 * B, HID), out.shape
    assert jnp.allclose(out, ref, atol=1e-5, rtol=1e-5), "mismatch vs JAX reference"

    print("KERNEL_OK")
</pallas_src>

<mosaic_0001>
module attributes {stable_mosaic.version = 11 : i64} {
  func.func @dynamics_net_kernel(%arg0: memref<4x16xf32, #tpu.memory_space<vmem>>, %arg1: memref<3x17x72xf32, #tpu.memory_space<vmem>>, %arg2: memref<4x24xf32, #tpu.memory_space<vmem>>) attributes {dimension_semantics = [], scalar_prefetch = 0 : i64, scratch_operands = 0 : i64, tpu.core_type = #tpu.core_type<tc>} {
    %cst = arith.constant 1.000000e+00 : f32
    %0 = vector.broadcast %cst : f32 to vector<4x1xf32>
    %cst_0 = arith.constant 0.000000e+00 : f32
    %1 = vector.broadcast %cst_0 : f32 to vector<4x4xf32>
    %2 = tpu.concatenate %0, %1 in 1 : vector<4x1xf32>, vector<4x4xf32> -> vector<4x5xf32>
    %c0 = arith.constant 0 : index
    %c0_1 = arith.constant 0 : index
    %3 = vector.load %arg0[%c0, %c0_1] : memref<4x16xf32, #tpu.memory_space<vmem>>, vector<4x16xf32>
    %4 = tpu.concatenate %3, %0 in 1 : vector<4x16xf32>, vector<4x1xf32> -> vector<4x17xf32>
    %c0_2 = arith.constant 0 : index
    %c0_3 = arith.constant 0 : index
    %c0_4 = arith.constant 0 : index
    %5 = vector.load %arg1[%c0_2, %c0_3, %c0_4] : memref<3x17x72xf32, #tpu.memory_space<vmem>>, vector<1x17x72xf32>
    %6 = vector.shape_cast %5 : vector<1x17x72xf32> to vector<17x72xf32>
    %cst_5 = arith.constant dense<0.000000e+00> : vector<4x72xf32>
    %7 = tpu.matmul %4, %6, %cst_5 {dimension_numbers = #tpu.dot_dimension_numbers<[1], [0], [0], [1], [0, 0, 1, 1], [], []>} : vector<4x17xf32>, vector<17x72xf32>, vector<4x72xf32> -> vector<4x72xf32>
    %8 = vector.extract_strided_slice %7 {offsets = [0, 0], sizes = [4, 12], strides = [1, 1]} : vector<4x72xf32> to vector<4x12xf32>
    %9 = arith.negf %8 : vector<4x12xf32>
    %10 = math.exp %9 : vector<4x12xf32>
    %cst_6 = arith.constant 1.000000e+00 : f32
    %11 = vector.broadcast %cst_6 : f32 to vector<4x12xf32>
    %12 = arith.addf %11, %10 : vector<4x12xf32>
    %13 = arith.divf %11, %12 : vector<4x12xf32>
    %14 = vector.extract_strided_slice %7 {offsets = [0, 12], sizes = [4, 12], strides = [1, 1]} : vector<4x72xf32> to vector<4x12xf32>
    %15 = math.tanh %14 : vector<4x12xf32>
    %16 = vector.extract_strided_slice %7 {offsets = [0, 24], sizes = [4, 12], strides = [1, 1]} : vector<4x72xf32> to vector<4x12xf32>
    %17 = arith.negf %16 : vector<4x12xf32>
    %18 = math.exp %17 : vector<4x12xf32>
    %cst_7 = arith.constant 1.000000e+00 : f32
    %19 = vector.broadcast %cst_7 : f32 to vector<4x12xf32>
    %20 = arith.addf %19, %18 : vector<4x12xf32>
    %21 = arith.divf %19, %20 : vector<4x12xf32>
    %22 = arith.mulf %13, %15 : vector<4x12xf32>
    %23 = math.tanh %22 : vector<4x12xf32>
    %24 = arith.mulf %21, %23 : vector<4x12xf32>
    %cst_8 = arith.constant 0.000000e+00 : f32
    %25 = vector.broadcast %cst_8 : f32 to vector<4x12xf32>
    %26 = arith.maximumf %24, %25 : vector<4x12xf32>
    %27 = tpu.concatenate %26, %2 in 1 : vector<4x12xf32>, vector<4x5xf32> -> vector<4x17xf32>
    %c1 = arith.constant 1 : index
    %c0_9 = arith.constant 0 : index
    %c0_10 = arith.constant 0 : index
    %28 = vector.load %arg1[%c1, %c0_9, %c0_10] : memref<3x17x72xf32, #tpu.memory_space<vmem>>, vector<1x17x72xf32>
    %29 = vector.shape_cast %28 : vector<1x17x72xf32> to vector<17x72xf32>
    %cst_11 = arith.constant dense<0.000000e+00> : vector<4x72xf32>
    %30 = tpu.matmul %27, %29, %cst_11 {dimension_numbers = #tpu.dot_dimension_numbers<[1], [0], [0], [1], [0, 0, 1, 1], [], []>} : vector<4x17xf32>, vector<17x72xf32>, vector<4x72xf32> -> vector<4x72xf32>
    %31 = vector.extract_strided_slice %30 {offsets = [0, 0], sizes = [4, 12], strides = [1, 1]} : vector<4x72xf32> to vector<4x12xf32>
    %32 = arith.negf %31 : vector<4x12xf32>
    %33 = math.exp %32 : vector<4x12xf32>
    %cst_12 = arith.constant 1.000000e+00 : f32
    %34 = vector.broadcast %cst_12 : f32 to vector<4x12xf32>
    %35 = arith.addf %34, %33 : vector<4x12xf32>
    %36 = arith.divf %34, %35 : vector<4x12xf32>
    %37 = vector.extract_strided_slice %30 {offsets = [0, 12], sizes = [4, 12], strides = [1, 1]} : vector<4x72xf32> to vector<4x12xf32>
    %38 = math.tanh %37 : vector<4x12xf32>
    %39 = vector.extract_strided_slice %30 {offsets = [0, 24], sizes = [4, 12], strides = [1, 1]} : vector<4x72xf32> to vector<4x12xf32>
    %40 = arith.negf %39 : vector<4x12xf32>
    %41 = math.exp %40 : vector<4x12xf32>
    %cst_13 = arith.constant 1.000000e+00 : f32
    %42 = vector.broadcast %cst_13 : f32 to vector<4x12xf32>
    %43 = arith.addf %42, %41 : vector<4x12xf32>
    %44 = arith.divf %42, %43 : vector<4x12xf32>
    %45 = arith.mulf %36, %38 : vector<4x12xf32>
    %46 = math.tanh %45 : vector<4x12xf32>
    %47 = arith.mulf %44, %46 : vector<4x12xf32>
    %cst_14 = arith.constant 0.000000e+00 : f32
    %48 = vector.broadcast %cst_14 : f32 to vector<4x12xf32>
    %49 = arith.cmpf ogt, %47, %48 : vector<4x12xf32>
    %50 = math.exp %47 : vector<4x12xf32>
    %cst_15 = arith.constant 1.000000e+00 : f32
    %51 = vector.broadcast %cst_15 : f32 to vector<4x12xf32>
    %52 = arith.subf %50, %51 : vector<4x12xf32>
    %cst_16 = arith.constant 1.67326319 : f32
    %53 = vector.broadcast %cst_16 : f32 to vector<4x12xf32>
    %54 = arith.mulf %53, %52 : vector<4x12xf32>
    %55 = arith.select %49, %47, %54 : vector<4x12xi1>, vector<4x12xf32>
    %cst_17 = arith.constant 1.05070102 : f32
    %56 = vector.broadcast %cst_17 : f32 to vector<4x12xf32>
    %57 = arith.mulf %56, %55 : vector<4x12xf32>
    %58 = tpu.concatenate %57, %2 in 1 : vector<4x12xf32>, vector<4x5xf32> -> vector<4x17xf32>
    %c2 = arith.constant 2 : index
    %c0_18 = arith.constant 0 : index
    %c0_19 = arith.constant 0 : index
    %59 = vector.load %arg1[%c2, %c0_18, %c0_19] : memref<3x17x72xf32, #tpu.memory_space<vmem>>, vector<1x17x72xf32>
    %60 = vector.shape_cast %59 : vector<1x17x72xf32> to vector<17x72xf32>
    %cst_20 = arith.constant dense<0.000000e+00> : vector<4x72xf32>
    %61 = tpu.matmul %58, %60, %cst_20 {dimension_numbers = #tpu.dot_dimension_numbers<[1], [0], [0], [1], [0, 0, 1, 1], [], []>} : vector<4x17xf32>, vector<17x72xf32>, vector<4x72xf32> -> vector<4x72xf32>
    %62 = vector.extract_strided_slice %61 {offsets = [0, 0], sizes = [4, 24], strides = [1, 1]} : vector<4x72xf32> to vector<4x24xf32>
    %63 = arith.negf %62 : vector<4x24xf32>
    %64 = math.exp %63 : vector<4x24xf32>
    %cst_21 = arith.constant 1.000000e+00 : f32
    %65 = vector.broadcast %cst_21 : f32 to vector<4x24xf32>
    %66 = arith.addf %65, %64 : vector<4x24xf32>
    %67 = arith.divf %65, %66 : vector<4x24xf32>
    %68 = vector.extract_strided_slice %61 {offsets = [0, 24], sizes = [4, 24], strides = [1, 1]} : vector<4x72xf32> to vector<4x24xf32>
    %69 = math.tanh %68 : vector<4x24xf32>
    %70 = vector.extract_strided_slice %61 {offsets = [0, 48], sizes = [4, 24], strides = [1, 1]} : vector<4x72xf32> to vector<4x24xf32>
    %71 = arith.negf %70 : vector<4x24xf32>
    %72 = math.exp %71 : vector<4x24xf32>
    %cst_22 = arith.constant 1.000000e+00 : f32
    %73 = vector.broadcast %cst_22 : f32 to vector<4x24xf32>
    %74 = arith.addf %73, %72 : vector<4x24xf32>
    %75 = arith.divf %73, %74 : vector<4x24xf32>
    %76 = arith.mulf %67, %69 : vector<4x24xf32>
    %77 = math.tanh %76 : vector<4x24xf32>
    %78 = arith.mulf %75, %77 : vector<4x24xf32>
    %79 = math.tanh %78 : vector<4x24xf32>
    %c0_23 = arith.constant 0 : index
    %c0_24 = arith.constant 0 : index
    %80 = vector.load %arg2[%c0_23, %c0_24] : memref<4x24xf32, #tpu.memory_space<vmem>>, vector<4x24xf32>
    tpu.vector_store %arg2[%c0_23, %c0_24], %79 {strides = array<i32>} : memref<4x24xf32, #tpu.memory_space<vmem>>, vector<4x24xf32>,
    return
  }
}

</mosaic_0001>

<bundles_post_ra>
// kernel: tpu_custom_call.1
= control target key start
LH: loop header
LB: loop body
LE: loop exit
PB: predicated region body
PF: predicated region fallthrough
CT: control target
= control target key end

     0   :  { %vm24_vm0 = vcmask 1040384   ;;  %v470_v1 = vmov 0.0   ;;  %vm15_vm1 = vcmask 130048   ;;  %vm471_vm2 = vmmov 0   ;;  %s555_s0 = inlined_call_operand.vmem [shape: f32[4,16], index: 0, kind: input, shape index: {}]   ;;  %s556_s1 = inlined_call_operand.vmem [shape: f32[3,17,72], index: 1, kind: input, shape index: {}]   ;;  %s557_s2 = inlined_call_operand.hbm [shape: f32[4,24], index: 2, kind: output, shape index: {}]  }
   0x1   :  { %v19_v0 = vld [vmem:[%s556_s1 + $0x10] sm:$0x1]  ;;  %384 = vmatprep.subr.mxu0 %v470_v1  ;;  %v18_v2 = vld [vmem:[%s556_s1 + $0x8] sm:$0xff]  ;;  %v14_v3 = vld [vmem:[%s555_s0] sm:$0xf]  ;;  %393 = vmatprep.subr.mxu1 %v470_v1 }
   0x2   :  { %385 = vmatpush3.msk.msra.mxu0 %vm24_vm0, %v19_v0  ;;  %390 = vmatprep.mubr.msk.f32.mxu0 %vm471_vm2, %v470_v1 }
   0x3   :  { %7 = vsyncpa [#allocation3], 0  ;;  %386 = vmatprep.subr.mxu0 %v470_v1  ;;  %v17_v4 = vld [vmem:[%s556_s1] sm:$0xff]  ;;  %399 = vmatprep.mubr.msk.f32.mxu1 %vm471_vm2, %v470_v1  ;;  %v16_v5 = vsel %vm15_vm1, %v14_v3, 1.0  ;;  %vm20_vm3 = vcmask 138240   ;;  %s472_s0 = smov 116  }
   0x4   :  { %387 = vmatpush3.msra.mxu0 %v18_v2  ;;  %s473_s17 = smov 24   ;;  %v361_v16 = vld [vmem:[%s556_s1 + $0x28] sm:$0x1]  ;;  %v360_v17 = vld [vmem:[%s556_s1 + $0x20] sm:$0xff]  ;;  %v359_v18 = vld [vmem:[%s556_s1 + $0x18] sm:$0xff]  ;;  %vm12_vm4 = vcmask 7168  }
   0x5   :  { %388 = vmatprep.subr.mxu0 %v470_v1  ;;  %394 = vmatpush3.msk.msra.mxu1 %vm24_vm0, %v361_v16  ;;  %s474_s24 = smov 104   ;;  %v13_v22 = vsel %vm12_vm4, 1.0, %v470_v1  ;;  %s475_s25 = smov 12   ;;  %vm125_vm5 = vcmask 97280   ;;  %v368_v36 = vld [vmem:[%s556_s1 + $0x40] sm:$0x1] }
   0x6   :  { %389 = vmatpush3.msra.mxu0 %v17_v4  ;;  %395 = vmatprep.subr.mxu1 %v470_v1  ;;  %v367_v37 = vld [vmem:[%s556_s1 + $0x38] sm:$0xff]  ;;  %v366_v41 = vld [vmem:[%s556_s1 + $0x30] sm:$0xff]  ;;  %s476_s1 = smov 48   ;;  %s477_s4 = smov 80   ;;  %vm340_vm7 = vcmask 191488  }
   0x7   :  { %391 = vmatmul.mubr.msk.f32.vlgmr.msra.gmra.mxu0 %vm20_vm3, %v16_v5  ;;  %402 = vmatprep.subr.mxu0 %v470_v1  ;;  %s478_s5 = smov [#allocation2]  }
   0x8   :  { %408 = vmatprep.mubr.msk.f32.mxu0 %vm471_vm2, %v470_v1  ;;  %396 = vmatpush3.msra.mxu1 %v360_v17  ;;  %s348_s6 = sshll.u32 %s478_s5, 4  ;;  %s349_s6 = int_to_ptr.vmem [resolvable:$true] %s348_s6 }
   0x9   :  { %397 = vmatprep.subr.mxu1 %v470_v1  ;;  %403 = vmatpush3.msk.msra.mxu0 %vm24_vm0, %v368_v36  ;;  %s448_s7 = scalar_lea.vmem %s349_s6, 64  ;;  %p453_p1 = scmp.lt.s32.totalorder %s349_s6, %s349_s6 }
   0xa   :  { %398 = vmatpush3.msra.mxu1 %v359_v18  ;;  %404 = vmatprep.subr.mxu0 %v470_v1  ;;  %p449_p0 = scmp.ne.s32.totalorder %s349_s6, %s448_s7  ;;  %p454_p2 = scmp.lt.s32.totalorder %s448_s7, %s448_s7 }
   0xb   :  { %405 = vmatpush3.msra.mxu0 %v367_v37 }
   0xc   :  { %406 = vmatprep.subr.mxu0 %v470_v1  ;;  %p455_p3 = por %p454_p2, %p453_p1 }
   0xd   :  { %407 = vmatpush3.msra.mxu0 %v366_v41 }
   0xe   :  { %p456_p4 = pnand %p455_p3, %p449_p0 }
  0xc7   :  { %v94_v6 = vpop.f32.mrf.mxu0 }
  0xc8   :  { %420 = vtanh.f32 %v94_v6  ;;  %v358_v9 = vmul.f32 -1.442695, %v94_v6 }
  0xc9   :  { %v392_v7 = vpop.f32.mrf.mxu0 }
  0xca   :  { %422 = vpow2.f32 %v358_v9 }
  0xd5   :  { %v421_v8 = vpop.eup %420 }
  0xd6   :  { %106 = vrot.lane.b32.xlu0 %v421_v8, %s472_s0 }
  0xd7   :  { %v423_v10 = vpop.eup %422 }
  0xd8   :  { %v101_v11 = vadd.f32 1.0, %v423_v10 }
  0xda   :  { %424 = vrcp.f32 %v101_v11 }
  0xe7   :  { %v425_v12 = vpop.eup %424 }
 0x148   :  { %v107_v13 = vpop.permute.xlu0 %106 }
 0x149   :  { %v109_v14 = vmul.f32 %v425_v12, %v107_v13 }
 0x14b   :  { %426 = vtanh.f32 %v109_v14 }
 0x158   :  { %v427_v15 = vpop.eup %426 }
 0x159   :  { %112 = vrot.lane.b32.xlu0 %v427_v15, %s473_s17 }
 0x1cb   :  { %v113_v19 = vpop.permute.xlu0 %112 }
 0x1cc   :  { %v115_v20 = vmul.f32 %v425_v12, %v113_v19 }
 0x1ce   :  { %v116_v21 = vmax.f32 %v115_v20, 0.0 }
 0x1d0   :  { %118 = vrot.lane.b32.xlu1 %v116_v21, %s474_s24 }
 0x1d4   :  { %122 = vrot.lane.b32.xlu1 %v13_v22, %s475_s25 }
 0x242   :  { %v119_v23 = vpop.permute.xlu1 %118 }
 0x246   :  { %v123_v24 = vpop.permute.xlu1 %122 }
 0x247   :  { %v126_v25 = vsel %vm125_vm5, %v119_v23, %v123_v24 }
 0x248   :  { %400 = vmatmul.mubr.msk.f32.vlgmr.msra.gmra.mxu1 %vm20_vm3, %v126_v25 }
 0x308   :  { %v203_v26 = vpop.f32.mrf.mxu1 }
 0x309   :  { %428 = vtanh.f32 %v203_v26  ;;  %v364_v29 = vmul.f32 -1.442695, %v203_v26 }
 0x30a   :  { %v401_v27 = vpop.f32.mrf.mxu1 }
 0x30b   :  { %430 = vpow2.f32 %v364_v29 }
 0x316   :  { %v429_v28 = vpop.eup %428 }
 0x317   :  { %215 = vrot.lane.b32.xlu0 %v429_v28, %s472_s0 }
 0x318   :  { %v431_v30 = vpop.eup %430 }
 0x319   :  { %v210_v31 = vadd.f32 1.0, %v431_v30 }
 0x31b   :  { %432 = vrcp.f32 %v210_v31 }
 0x328   :  { %v433_v32 = vpop.eup %432 }
 0x389   :  { %v216_v33 = vpop.permute.xlu0 %215 }
 0x38a   :  { %v218_v34 = vmul.f32 %v433_v32, %v216_v33 }
 0x38c   :  { %434 = vtanh.f32 %v218_v34 }
 0x399   :  { %v435_v35 = vpop.eup %434 }
 0x39a   :  { %221 = vrot.lane.b32.xlu1 %v435_v35, %s473_s17 }
 0x40c   :  { %v222_v38 = vpop.permute.xlu1 %221 }
 0x40d   :  { %v224_v39 = vmul.f32 %v433_v32, %v222_v38 }
 0x40f   :  { %v226_v40 = vmul.f32 1.442695, %v224_v39  ;;  %vm225_vm6 = vcmp.gt.f32.partialorder %v224_v39, 0.0 }
 0x411   :  { %436 = vpow2.f32 %v226_v40 }
 0x41e   :  { %v437_v42 = vpop.eup %436 }
 0x41f   :  { %v365_v43 = vadd.f32 -1.0, %v437_v42 }
 0x421   :  { %v229_v44 = vmul.f32 1.6732632, %v365_v43 }
 0x423   :  { %v230_v45 = vsel %vm225_vm6, %v224_v39, %v229_v44 }
 0x424   :  { %v231_v46 = vmul.f32 1.050701, %v230_v45 }
 0x426   :  { %233 = vrot.lane.b32.xlu0 %v231_v46, %s474_s24 }
 0x498   :  { %v234_v47 = vpop.permute.xlu0 %233 }
 0x499   :  { %v236_v48 = vsel %vm125_vm5, %v234_v47, %v123_v24 }
 0x49a   :  { %409 = vmatmul.mubr.msk.f32.vlgmr.msra.gmra.mxu0 %vm20_vm3, %v236_v48 }
 0x55a   :  { %v313_v49 = vpop.f32.mrf.mxu0 }
 0x55b   :  { %438 = vtanh.f32 %v313_v49  ;;  %v371_v52 = vmul.f32 -1.442695, %v313_v49 }
 0x55c   :  { %v410_v50 = vpop.f32.mrf.mxu0 }
 0x55d   :  { %440 = vpow2.f32 %v371_v52 }
 0x568   :  { %v439_v51 = vpop.eup %438 }
 0x569   :  { %325 = vrot.lane.b32.xlu1 %v439_v51, %s474_s24 }
 0x56a   :  { %v441_v53 = vpop.eup %440 }
 0x56b   :  { %v320_v54 = vadd.f32 1.0, %v441_v53 }
 0x56d   :  { %442 = vrcp.f32 %v320_v54 }
 0x57a   :  { %v443_v55 = vpop.eup %442 }
 0x5db   :  { %v326_v56 = vpop.permute.xlu1 %325 }
 0x5dc   :  { %v328_v57 = vmul.f32 %v443_v55, %v326_v56 }
 0x5de   :  { %444 = vtanh.f32 %v328_v57 }
 0x5eb   :  { %v445_v58 = vpop.eup %444 }
 0x5ec   :  { %331 = vrot.lane.b32.xlu0 %v445_v58, %s476_s1 }
 0x65e   :  { %v332_v59 = vpop.permute.xlu0 %331 }
 0x65f   :  { %v334_v60 = vmul.f32 %v443_v55, %v332_v59 }
 0x661   :  { %446 = vtanh.f32 %v334_v60 }
 0x66e   :  { %v447_v61 = vpop.eup %446 }
 0x66f   :  { %337 = vrot.lane.b32.xlu1 %v447_v61, %s477_s4 }
 0x6e1   :  { %v338_v62 = vpop.permute.xlu1 %337 }
 0x6e2   :  { %341 = vst.msk [vmem:[#allocation2] sm:$0xf] %vm340_vm7, %v338_v62 }
 0x6e3   :  { %459 = shalt.err (!%p456_p4)
}
 0x6e4   :  { %351 = dma.vmem_to_hbm [thread:$0]  %s349_s6, 64, %s557_s2, [#allocation3]  }
 0x6e5   :  { %468 = dma.done.wait [#allocation3], 64  }
 0x6e6   :  { %469 = vsyncadd [#allocation3], 4294967232 }
 0x6e7   :  { %355 = vsyncpa [#allocation3], 1 }

</bundles_post_ra>
